<compile_context>
chip_gen: v5e
topology: v5e:2x2
jax: 0.10.0
libtpu: 0.0.40
codegen_flags: <defaults>
</compile_context>

<pallas_src>
import jax
import jax.numpy as jnp
from jax.experimental import pallas as pl
from jax.experimental.pallas import tpu as pltpu

LANES = 128
SUBLANES = 8
CHUNK_ROWS = 512  # inner sub-chunk (rows); bounds live elementwise temporaries


def _vmem_capacity_bytes():
    try:
        return int(pltpu.get_tpu_info().vmem_capacity_bytes)
    except Exception:
        return 64 * 1024 * 1024  # conservative (v7x-sized) fallback


def _pick_tile_rows(itemsize, n_rows, vmem_bytes):
    """Rows per grid step: 2 inputs x 2 pipeline buffers use ~1/3 of VMEM."""
    budget = vmem_bytes // 3
    rows = budget // (2 * 2 * LANES * max(int(itemsize), 1))
    rows = max(SUBLANES, min(rows, 32768))  # sanity cap: 16 MiB f32 per buffer
    if rows >= CHUNK_ROWS:
        rows = (rows // CHUNK_ROWS) * CHUNK_ROWS
    else:
        rows = (rows // SUBLANES) * SUBLANES
    rows = min(rows, n_rows)                # n_rows is a multiple of SUBLANES
    return max(rows, SUBLANES)


def _make_kernel(tile_rows, n_rows, chunk_rows):
    n_full_chunks = tile_rows // chunk_rows
    rem_rows = tile_rows - n_full_chunks * chunk_rows
    has_tail_tile = (n_rows % tile_rows) != 0  # static

    def _chunk(x_ref, y_ref, row0, nrows, acc_i, acc_s, valid_rows):
        """Accumulate one [nrows, LANES] sub-chunk (nrows static, multiple of 8)."""
        x = x_ref[pl.ds(row0, nrows), :].astype(jnp.float32)
        y = y_ref[pl.ds(row0, nrows), :].astype(jnp.float32)
        prod = x * y
        s = x + y                              # sum(x) + sum(y) == sum(x + y)
        if valid_rows is not None:
            # tail-only masking: (nrows, 1) row iota; lanes handled by broadcast
            rid = jax.lax.broadcasted_iota(jnp.int32, (nrows, 1), 0) + row0
            keep = rid < valid_rows
            prod = jnp.where(keep, prod, 0.0)
            s = jnp.where(keep, s, 0.0)
        acc_i = acc_i + prod.reshape(-1, SUBLANES, LANES).sum(axis=0)
        acc_s = acc_s + s.reshape(-1, SUBLANES, LANES).sum(axis=0)
        return acc_i, acc_s

    def kernel(x_ref, y_ref, inter_ref, sum_ref):
        k = pl.program_id(0)

        @pl.when(k == 0)
        def _():
            inter_ref[...] = jnp.zeros_like(inter_ref)
            sum_ref[...] = jnp.zeros_like(sum_ref)

        zeros = jnp.zeros((SUBLANES, LANES), jnp.float32)

        def accumulate(valid_rows):
            def body(j, carry):
                acc_i, acc_s = carry
                row0 = pl.multiple_of(j * chunk_rows, chunk_rows)
                return _chunk(x_ref, y_ref, row0, chunk_rows, acc_i, acc_s,
                              valid_rows)

            acc_i, acc_s = zeros, zeros
            if n_full_chunks > 0:
                acc_i, acc_s = jax.lax.fori_loop(0, n_full_chunks, body,
                                                 (acc_i, acc_s))
            if rem_rows:
                acc_i, acc_s = _chunk(x_ref, y_ref, n_full_chunks * chunk_rows,
                                      rem_rows, acc_i, acc_s, valid_rows)
            inter_ref[...] += acc_i
            sum_ref[...] += acc_s

        if not has_tail_tile:
            accumulate(None)                   # every tile full: no masking at all
        else:
            is_full = (k + 1) * tile_rows <= n_rows

            @pl.when(is_full)
            def _():
                accumulate(None)               # bulk tiles: unmasked hot path

            @pl.when(jnp.logical_not(is_full))
            def _():
                accumulate(n_rows - k * tile_rows)  # single tail tile: masked

    return kernel


def dice_loss(inp, target, smooth=1e-5):
    x = jnp.ravel(inp)
    y = jnp.ravel(target)
    if not jnp.issubdtype(x.dtype, jnp.floating):
        x = x.astype(jnp.float32)
    if not jnp.issubdtype(y.dtype, jnp.floating):
        y = y.astype(jnp.float32)

    n = x.shape[0]
    pad = (-n) % (SUBLANES * LANES)  # <= 1023 zero elements; sum-neutral
    if pad:
        x = jnp.pad(x, (0, pad))
        y = jnp.pad(y, (0, pad))
    n_rows = (n + pad) // LANES      # multiple of SUBLANES
    x = x.reshape(n_rows, LANES)
    y = y.reshape(n_rows, LANES)

    itemsize = max(x.dtype.itemsize, y.dtype.itemsize)
    vmem_bytes = _vmem_capacity_bytes()
    tile_rows = _pick_tile_rows(itemsize, n_rows, vmem_bytes)
    chunk_rows = min(CHUNK_ROWS, tile_rows)
    n_tiles = -(-n_rows // tile_rows)

    # Explicit VMEM limit: double-buffered inputs + chunk temporaries + headroom.
    in_bytes = 2 * 2 * tile_rows * LANES * itemsize
    tmp_bytes = 6 * chunk_rows * LANES * 4
    vmem_limit = int(max(16 << 20,
                         min(in_bytes + tmp_bytes + (4 << 20),
                             int(vmem_bytes * 0.9))))

    kernel = _make_kernel(tile_rows, n_rows, chunk_rows)

    # TODO(synk): explicit dual-TensorCore split (pl.core_map / CORE_PARALLEL) for
    # v7x is not engaged here; single reduction axis keeps 1-TC chips optimal.
    inter_vec, sum_vec = pl.pallas_call(
        kernel,
        out_shape=(
            jax.ShapeDtypeStruct((SUBLANES, LANES), jnp.float32),
            jax.ShapeDtypeStruct((SUBLANES, LANES), jnp.float32),
        ),
        grid_spec=pltpu.PrefetchScalarGridSpec(
            num_scalar_prefetch=0,
            grid=(n_tiles,),
            in_specs=[
                pl.BlockSpec((tile_rows, LANES), lambda k: (k, 0)),
                pl.BlockSpec((tile_rows, LANES), lambda k: (k, 0)),
            ],
            out_specs=[
                pl.BlockSpec((SUBLANES, LANES), lambda k: (0, 0)),
                pl.BlockSpec((SUBLANES, LANES), lambda k: (0, 0)),
            ],
        ),
        compiler_params=pltpu.CompilerParams(
            dimension_semantics=("arbitrary",),
            vmem_limit_bytes=vmem_limit,
        ),
    )(x, y)

    # Tiny epilogue in plain JAX: vector partials -> scalars -> dice.
    intersection = jnp.sum(inter_vec)
    union = jnp.sum(sum_vec)
    dice = (2.0 * intersection + smooth) / (union + smooth)
    return (1.0 - dice).astype(jnp.float32)


def dice_loss_ref(inp, target, smooth=1e-5):
    x = jnp.ravel(inp).astype(jnp.float32)
    y = jnp.ravel(target).astype(jnp.float32)
    intersection = jnp.sum(x * y)
    union = jnp.sum(x) + jnp.sum(y)
    return 1.0 - (2.0 * intersection + smooth) / (union + smooth)


if __name__ == "__main__":
    key = jax.random.PRNGKey(0)
    k1, k2 = jax.random.split(key)
    # NCHW, small shapes: batch=2, channels=4, spatial=16x16
    inp = jax.nn.sigmoid(jax.random.normal(k1, (2, 4, 16, 16), dtype=jnp.float32))
    tgt = (jax.random.uniform(k2, (2, 4, 16, 16)) > 0.5).astype(jnp.float32)

    loss = jax.block_until_ready(dice_loss(inp, tgt))
    ref = jax.block_until_ready(dice_loss_ref(inp, tgt))
    assert jnp.allclose(loss, ref, rtol=1e-5, atol=1e-6), (loss, ref)
    print("KERNEL_OK")
</pallas_src>

<mosaic_0001>
module attributes {stable_mosaic.version = 11 : i64} {
  func.func @kernel(%arg0: i32, %arg1: memref<16x128xf32, #tpu.memory_space<vmem>>, %arg2: memref<16x128xf32, #tpu.memory_space<vmem>>, %arg3: memref<8x128xf32, #tpu.memory_space<vmem>>, %arg4: memref<8x128xf32, #tpu.memory_space<vmem>>) attributes {dimension_semantics = [#tpu.dimension_semantics<arbitrary>], iteration_bounds = array<i64: 1>, scalar_prefetch = 0 : i64, scratch_operands = 0 : i64, tpu.core_type = #tpu.core_type<tc>, window_params = [{transform_indices = @transform_0, window_bounds = array<i64: 16, 128>}, {transform_indices = @transform_1, window_bounds = array<i64: 16, 128>}, {pipeline_mode = #tpu.pipeline_mode<synchronous>, transform_indices = @transform_2, window_bounds = array<i64: 8, 128>}, {pipeline_mode = #tpu.pipeline_mode<synchronous>, transform_indices = @transform_3, window_bounds = array<i64: 8, 128>}]} {
    %c0_i32 = arith.constant 0 : i32
    %0 = arith.cmpi eq, %arg0, %c0_i32 : i32
    %1 = arith.extui %0 : i1 to i32
    %c0_i32_0 = arith.constant 0 : i32
    %2 = arith.cmpi ne, %1, %c0_i32_0 : i32
    scf.if %2 {
      %cst_13 = arith.constant 0.000000e+00 : f32
      %24 = vector.broadcast %cst_13 : f32 to vector<8x128xf32>
      %c0_14 = arith.constant 0 : index
      %c0_15 = arith.constant 0 : index
      %25 = vector.load %arg3[%c0_14, %c0_15] : memref<8x128xf32, #tpu.memory_space<vmem>>, vector<8x128xf32>
      tpu.vector_store %arg3[%c0_14, %c0_15], %24 {strides = array<i32>} : memref<8x128xf32, #tpu.memory_space<vmem>>, vector<8x128xf32>,
      %cst_16 = arith.constant 0.000000e+00 : f32
      %26 = vector.broadcast %cst_16 : f32 to vector<8x128xf32>
      %c0_17 = arith.constant 0 : index
      %c0_18 = arith.constant 0 : index
      %27 = vector.load %arg4[%c0_17, %c0_18] : memref<8x128xf32, #tpu.memory_space<vmem>>, vector<8x128xf32>
      tpu.vector_store %arg4[%c0_17, %c0_18], %26 {strides = array<i32>} : memref<8x128xf32, #tpu.memory_space<vmem>>, vector<8x128xf32>,
    } else {
    }
    %cst = arith.constant 0.000000e+00 : f32
    %3 = vector.broadcast %cst : f32 to vector<8x128xf32>
    %c0_i32_1 = arith.constant 0 : i32
    %c16_i32 = arith.constant 16 : i32
    %4 = arith.muli %c0_i32_1, %c16_i32 : i32
    %5 = tpu.assume_multiple %4, 16 : i32
    %6 = arith.index_cast %5 : i32 to index
    %c0 = arith.constant 0 : index
    %7 = vector.load %arg1[%6, %c0] : memref<16x128xf32, #tpu.memory_space<vmem>>, vector<16x128xf32>
    %8 = arith.index_cast %5 : i32 to index
    %c0_2 = arith.constant 0 : index
    %9 = vector.load %arg2[%8, %c0_2] : memref<16x128xf32, #tpu.memory_space<vmem>>, vector<16x128xf32>
    %10 = arith.mulf %7, %9 : vector<16x128xf32>
    %11 = arith.addf %7, %9 : vector<16x128xf32>
    %12 = vector.shape_cast %10 : vector<16x128xf32> to vector<2x8x128xf32>
    %cst_3 = arith.constant dense<0.000000e+00> : vector<8x128xf32>
    %13 = vector.multi_reduction <add>, %12, %cst_3 [0] : vector<2x8x128xf32> to vector<8x128xf32>
    %14 = arith.addf %3, %13 : vector<8x128xf32>
    %15 = vector.shape_cast %11 : vector<16x128xf32> to vector<2x8x128xf32>
    %cst_4 = arith.constant dense<0.000000e+00> : vector<8x128xf32>
    %16 = vector.multi_reduction <add>, %15, %cst_4 [0] : vector<2x8x128xf32> to vector<8x128xf32>
    %17 = arith.addf %3, %16 : vector<8x128xf32>
    %c1_i32 = arith.constant 1 : i32
    %c0_5 = arith.constant 0 : index
    %c0_6 = arith.constant 0 : index
    %18 = vector.load %arg3[%c0_5, %c0_6] : memref<8x128xf32, #tpu.memory_space<vmem>>, vector<8x128xf32>
    %19 = arith.addf %18, %14 : vector<8x128xf32>
    %c0_7 = arith.constant 0 : index
    %c0_8 = arith.constant 0 : index
    %20 = vector.load %arg3[%c0_7, %c0_8] : memref<8x128xf32, #tpu.memory_space<vmem>>, vector<8x128xf32>
    tpu.vector_store %arg3[%c0_7, %c0_8], %19 {strides = array<i32>} : memref<8x128xf32, #tpu.memory_space<vmem>>, vector<8x128xf32>,
    %c0_9 = arith.constant 0 : index
    %c0_10 = arith.constant 0 : index
    %21 = vector.load %arg4[%c0_9, %c0_10] : memref<8x128xf32, #tpu.memory_space<vmem>>, vector<8x128xf32>
    %22 = arith.addf %21, %17 : vector<8x128xf32>
    %c0_11 = arith.constant 0 : index
    %c0_12 = arith.constant 0 : index
    %23 = vector.load %arg4[%c0_11, %c0_12] : memref<8x128xf32, #tpu.memory_space<vmem>>, vector<8x128xf32>
    tpu.vector_store %arg4[%c0_11, %c0_12], %22 {strides = array<i32>} : memref<8x128xf32, #tpu.memory_space<vmem>>, vector<8x128xf32>,
    return
  }
  func.func @transform_0(%arg0: i32) -> (i32, i32) {
    %c0_i32 = arith.constant 0 : i32
    %c0_i32_0 = arith.constant 0 : i32
    return %arg0, %c0_i32 : i32, i32
  }
  func.func @transform_1(%arg0: i32) -> (i32, i32) {
    %c0_i32 = arith.constant 0 : i32
    %c0_i32_0 = arith.constant 0 : i32
    return %arg0, %c0_i32 : i32, i32
  }
  func.func @transform_2(%arg0: i32) -> (i32, i32) {
    %c0_i32 = arith.constant 0 : i32
    %c0_i32_0 = arith.constant 0 : i32
    %c0_i32_1 = arith.constant 0 : i32
    return %c0_i32, %c0_i32_0 : i32, i32
  }
  func.func @transform_3(%arg0: i32) -> (i32, i32) {
    %c0_i32 = arith.constant 0 : i32
    %c0_i32_0 = arith.constant 0 : i32
    %c0_i32_1 = arith.constant 0 : i32
    return %c0_i32, %c0_i32_0 : i32, i32
  }
}

</mosaic_0001>

<bundles_post_ra>
// kernel: tpu_custom_call.1
= control target key start
LH: loop header
LB: loop body
LE: loop exit
PB: predicated region body
PF: predicated region fallthrough
CT: control target
= control target key end

     0   :  { %9 = vsyncpa [#allocation3], 0  ;;  %s254_s0 = inlined_call_operand.hbm [shape: f32[16,128], index: 0, kind: input, shape index: {}]   ;;  %s255_s1 = inlined_call_operand.hbm [shape: f32[16,128], index: 1, kind: input, shape index: {}]   ;;  %s256_s2 = inlined_call_operand.hbm [shape: f32[8,128], index: 2, kind: output, shape index: {0}]   ;;  %s257_s3 = inlined_call_operand.hbm [shape: f32[8,128], index: 3, kind: output, shape index: {1}]  }
   0x1   :  { %10 = vsyncpa [#allocation6], 0 }
   0x2   :  { %11 = vsyncpa [#allocation4], 0 }
   0x3   :  { %12 = vsyncpa [#allocation9], 0  ;;  %s17_s14 = sshll.u32 %s254_s0, 4  ;;  %s216_s15 = smov [#allocation2]   ;;  %s18_s14 = int_to_ptr.hbm [resolvable:$true] %s17_s14 }
   0x4   :  { %s19_s16 = sshll.u32 %s216_s15, 4  ;;  %s30_s19 = sshll.u32 %s255_s1, 4  ;;  %s20_s16 = int_to_ptr.vmem [resolvable:$true] %s19_s16  ;;  %s31_s19 = int_to_ptr.hbm [resolvable:$true] %s30_s19 }
   0x5   :  { %s217_s20 = smov 128   ;;  %s218_s21 = smov 8  }
   0x6   :  { %25 = dma.hbm_to_vmem [thread:$0]  %s18_s14, 256, %s20_s16, [#allocation3], %s217_s20, %s217_s20, %s218_s21  }
   0x7   :  { %s219_s22 = smov [#allocation5]  }
   0x8   :  { %s32_s23 = sshll.u32 %s219_s22, 4  ;;  %s33_s23 = int_to_ptr.vmem [resolvable:$true] %s32_s23 }
   0x9   :  { %38 = dma.hbm_to_vmem [thread:$0]  %s31_s19, 256, %s33_s23, [#allocation6], %s217_s20, %s217_s20, %s218_s21  }
   0xa   :  { %208 = dma.done.wait [#allocation3], 256  }
   0xb   :  { %209 = vsyncadd [#allocation3], 4294967040 }
   0xc   :  { %210 = dma.done.wait [#allocation6], 256  }
   0xd   :  { %211 = vsyncadd [#allocation6], 4294967040  ;;  %v53_v0 = vld [vmem:[#allocation2] sm:$0xff]  ;;  %v54_v1 = vld [vmem:[#allocation2 + $0x8] sm:$0xff]  ;;  %s220_s0 = smov [#allocation7]   ;;  %s78_s26 = sshll.u32 %s256_s2, 4  ;;  %s79_s26 = int_to_ptr.hbm [resolvable:$true] %s78_s26 }
   0xe   :  { %v55_v2 = vld [vmem:[#allocation5] sm:$0xff]  ;;  %v56_v3 = vld [vmem:[#allocation5 + $0x8] sm:$0xff]  ;;  %s76_s1 = sshll.u32 %s220_s0, 4  ;;  %s221_s27 = smov [#allocation8]   ;;  %s77_s1 = int_to_ptr.vmem [resolvable:$true] %s76_s1 }
   0xf   :  { %v57_v4 = vmul.f32 %v55_v2, %v53_v0  ;;  %v59_v5 = vadd.f32 %v55_v2, %v53_v0  ;;  %v58_v6 = vmul.f32 %v56_v3, %v54_v1  ;;  %v60_v7 = vadd.f32 %v56_v3, %v54_v1  ;;  %s87_s28 = sshll.u32 %s221_s27, 4  ;;  %s89_s4 = sshll.u32 %s257_s3, 4  ;;  %s88_s28 = int_to_ptr.vmem [resolvable:$true] %s87_s28  ;;  %s90_s4 = int_to_ptr.hbm [resolvable:$true] %s89_s4 }
  0x11   :  { %v61_v8 = vadd.f32 %v58_v6, %v57_v4  ;;  %v63_v9 = vadd.f32 %v60_v7, %v59_v5 }
  0x13   :  { %67 = vst [vmem:[#allocation7] sm:$0xff] %v61_v8 }
  0x14   :  { %70 = vst [vmem:[#allocation8] sm:$0xff] %v63_v9  ;;  %81 = dma.vmem_to_hbm [thread:$0]  %s77_s1, 128, %s79_s26, [#allocation4]  }
  0x15   :  { %92 = dma.vmem_to_hbm [thread:$0]  %s88_s28, 128, %s90_s4, [#allocation9]  }
  0x16   :  { %212 = dma.done.wait [#allocation4], 128  }
  0x17   :  { %213 = vsyncadd [#allocation4], 4294967168 }
  0x18   :  { %214 = dma.done.wait [#allocation9], 128  }
  0x19   :  { %215 = vsyncadd [#allocation9], 4294967168 }
  0x1a   :  { %101 = vsyncpa [#allocation3], 1 }
  0x1b   :  { %102 = vsyncpa [#allocation6], 1 }
  0x1c   :  { %103 = vsyncpa [#allocation4], 1 }
  0x1d   :  { %104 = vsyncpa [#allocation9], 1 }

</bundles_post_ra>
